<compile_context>
chip_gen: v6e
topology: v6e:2x2x1
jax: 0.10.0
libtpu: 0.0.40
codegen_flags: <defaults>
</compile_context>

<pallas_src>
import functools

import jax
import jax.numpy as jnp
from jax.experimental import pallas as pl
from jax.experimental.pallas import tpu as pltpu


# ----------------------------------------------------------------------------
# Kernel
# ----------------------------------------------------------------------------
def _multinorm_kernel(x_ref, w_ref, o_ref, xn_ref, *, eps, inv_dim,
                      heads_per_group, unroll_heads):
    # x_ref : (TM, D)        input rows for this (batch, row-tile) block
    # w_ref : (H, D)         all per-head RMSNorm weights (VMEM resident)
    # o_ref : (HG, TM, D)    output slab for one head group
    # xn_ref: (TM, D) f32    normalised rows, cached across the head-group axis

    @pl.when(pl.program_id(2) == 0)
    def _():
        x = x_ref[...].astype(jnp.float32)
        ms = jnp.sum(x * x, axis=-1, keepdims=True) * inv_dim     # mean(x^2)
        xn_ref[...] = x * jax.lax.rsqrt(ms + eps)

    xn = xn_ref[...]

    if unroll_heads:
        # Single head group, small H: hoist one weight load/cast, static slices.
        w = w_ref[...].astype(jnp.float32)
        for h in range(heads_per_group):
            o_ref[h] = (xn * w[h:h + 1, :]).astype(o_ref.dtype)
    else:
        # fori_loop bounds the live set to one (TM, D) product per iteration.
        h0 = pl.program_id(2) * heads_per_group
        def body(h, carry):
            w_h = w_ref[pl.ds(h0 + h, 1), :].astype(jnp.float32)  # (1, D)
            o_ref[h] = (xn * w_h).astype(o_ref.dtype)
            return carry
        jax.lax.fori_loop(0, heads_per_group, body, 0)


# ----------------------------------------------------------------------------
# Tiling helpers
# ----------------------------------------------------------------------------
def _vmem_capacity_bytes() -> int:
    try:
        return int(pltpu.get_tpu_info().vmem_capacity_bytes)
    except Exception:
        pass
    try:
        kind = jax.devices()[0].device_kind.lower()
    except Exception:
        kind = ""
    if "v7" in kind or "7x" in kind:
        return 64 * 1024 * 1024
    return 128 * 1024 * 1024          # v5e / v6e


def _round_down(x: int, m: int) -> int:
    return (x // m) * m


def _divisors_desc(n: int):
    return sorted((d for d in range(1, n + 1) if n % d == 0), reverse=True)


def _fit_row_tile(budget, T, D, H, hg, x_bytes, w_bytes, o_bytes, row_align):
    """Largest row tile whose pipelined blocks fit `budget` for head-group hg."""
    fixed = 2 * H * D * w_bytes                    # resident (double-buffered) weights
    per_row = D * (2 * x_bytes                     # x block, double-buffered
                   + 2 * hg * o_bytes              # output block, double-buffered
                   + 4                             # xn scratch (f32)
                   + 12                            # f32 temporaries (x, x*x, product)
                   + min(hg, 8) * o_bytes)         # unrolled-store slack
    avail = budget - fixed
    if avail <= 0:
        return 0
    tm = min(avail // per_row, 1024)               # step overhead amortised by 1K rows
    if tm >= T:
        return T                                   # full extent: no alignment needed
    return _round_down(tm, row_align)


def _choose_tiles(T, D, H, x_bytes, w_bytes, o_bytes, budget, row_align,
                  heads_per_group=None):
    """Pick (row_tile, heads_per_group).  hg always divides H (no ragged heads)."""
    if heads_per_group is not None:
        hg = max(d for d in _divisors_desc(H) if d <= max(1, heads_per_group))
        tm = _fit_row_tile(budget, T, D, H, hg, x_bytes, w_bytes, o_bytes, row_align)
    else:
        target = min(T, 512)
        tm, hg = 0, H
        for hg in _divisors_desc(H):
            tm = _fit_row_tile(budget, T, D, H, hg, x_bytes, w_bytes, o_bytes, row_align)
            if tm >= target:
                break
    if tm <= 0:
        tm = min(T, row_align)                     # best effort; practically unreachable
    return tm, hg


# ----------------------------------------------------------------------------
# Wrapper
# ----------------------------------------------------------------------------
def multinorm(x: jnp.ndarray, weights: jnp.ndarray, eps: float = 1e-5, *,
              heads_per_group=None) -> jnp.ndarray:
    """x: (B, T, D); weights: (H, D) per-head RMSNorm scales.

    Returns (B, H, T, D) == torch.stack([norm_h(x) for h in range(H)], dim=1).
    """
    B, T, D = x.shape
    H, Dw = weights.shape
    assert Dw == D, (Dw, D)
    # TODO(synk): if D is ever not a multiple of 128, pad D on the wrapper side
    # when masked stores dominate; the kernel is correct for any D as written.

    x_bytes = jnp.dtype(x.dtype).itemsize
    o_bytes = x_bytes
    w_bytes = jnp.dtype(weights.dtype).itemsize
    row_align = max(8, (8 * 4) // x_bytes)         # sublane packing: f32 8, bf16 16, i8 32

    vmem_cap = _vmem_capacity_bytes()
    vmem_limit = int(vmem_cap * 0.9)               # leave a little for Mosaic internals
    budget = int(vmem_limit * 0.8)                 # single hedge; per-row cost itemised

    tm, hg = _choose_tiles(T, D, H, x_bytes, w_bytes, o_bytes, budget, row_align,
                           heads_per_group)
    n_t = pl.cdiv(T, tm)
    # Megacore: make sure the parallel axes carry >= 2 programs (v7x has 2 TCs).
    if B * n_t < 2 and T >= 2 * row_align:
        tm = max(row_align, _round_down((T + 1) // 2, row_align))
        n_t = pl.cdiv(T, tm)
    n_hg = H // hg
    unroll_heads = (n_hg == 1 and H <= 8)

    kernel = functools.partial(
        _multinorm_kernel, eps=float(eps), inv_dim=1.0 / float(D),
        heads_per_group=hg, unroll_heads=unroll_heads)

    cost = pl.CostEstimate(
        flops=int((3 + H) * B * T * D),
        transcendentals=int(B * T),
        bytes_accessed=int(B * T * D * x_bytes + B * H * T * D * o_bytes
                           + H * D * w_bytes))

    return pl.pallas_call(
        kernel,
        out_shape=jax.ShapeDtypeStruct((B, H, T, D), x.dtype),
        grid_spec=pltpu.PrefetchScalarGridSpec(
            num_scalar_prefetch=0,
            grid=(B, n_t, n_hg),
            in_specs=[
                pl.BlockSpec((None, tm, D), lambda b, t, g: (b, t, 0)),   # x rows
                pl.BlockSpec((H, D), lambda b, t, g: (0, 0)),             # all weights
            ],
            # Output emitted directly in (B, H, T, D) — no post-kernel transpose.
            out_specs=pl.BlockSpec((None, hg, tm, D), lambda b, t, g: (b, g, t, 0)),
            scratch_shapes=[pltpu.VMEM((tm, D), jnp.float32)],            # cached xn
        ),
        compiler_params=pltpu.CompilerParams(
            dimension_semantics=("parallel", "parallel", "arbitrary"),
            vmem_limit_bytes=vmem_limit),
        cost_estimate=cost,
    )(x, weights)


# ----------------------------------------------------------------------------
# Reference + demo
# ----------------------------------------------------------------------------
def _reference(x, weights, eps=1e-5):
    xf = x.astype(jnp.float32)
    ms = jnp.mean(xf * xf, axis=-1, keepdims=True)
    xn = xf * jax.lax.rsqrt(ms + eps)                                    # (B, T, D)
    y = xn[:, None, :, :] * weights[None, :, None, :].astype(jnp.float32)
    return y.astype(x.dtype)                                             # (B, H, T, D)


if __name__ == "__main__":
    key = jax.random.PRNGKey(0)

    cases = [
        # (name, B, T, D, H, forced heads_per_group)
        ("unrolled-heads", 2, 8, 128, 2, None),     # small H -> static unroll path
        ("fori-heads",     1, 32, 256, 12, None),   # H > 8 -> fori_loop + megacore split
        ("head-groups",    2, 16, 128, 12, 4),      # multi head-group path + xn scratch reuse
    ]

    for idx, (name, B, T, D, H, hpg) in enumerate(cases):
        kx, kw = jax.random.split(jax.random.fold_in(key, idx))
        x = jax.random.normal(kx, (B, T, D), dtype=jnp.float32)
        # Per-head RMSNorm weights (ones perturbed slightly so heads differ).
        w = jnp.ones((H, D), jnp.float32) + 0.01 * jax.random.normal(
            kw, (H, D), dtype=jnp.float32)

        y = jax.block_until_ready(multinorm(x, w, eps=1e-5, heads_per_group=hpg))
        y_ref = _reference(x, w, eps=1e-5)

        assert y.shape == (B, H, T, D), (name, y.shape)
        assert jnp.allclose(y, y_ref, atol=1e-5, rtol=1e-5), f"mismatch vs reference: {name}"

    print("KERNEL_OK")
</pallas_src>

<mosaic_0001>
module attributes {stable_mosaic.version = 11 : i64} {
  func.func @_multinorm_kernel(%arg0: i32, %arg1: i32, %arg2: i32, %arg3: memref<1x8x128xf32, #tpu.memory_space<vmem>>, %arg4: memref<2x128xf32, #tpu.memory_space<vmem>>, %arg5: memref<1x2x8x128xf32, #tpu.memory_space<vmem>>, %arg6: memref<8x128xf32, #tpu.memory_space<vmem>>) attributes {dimension_semantics = [#tpu.dimension_semantics<parallel>, #tpu.dimension_semantics<parallel>, #tpu.dimension_semantics<arbitrary>], iteration_bounds = array<i64: 2, 1, 1>, scalar_prefetch = 0 : i64, scratch_operands = 1 : i64, tpu.core_type = #tpu.core_type<tc>, window_params = [{transform_indices = @transform_0, window_bounds = array<i64: 1, 8, 128>}, {pipeline_mode = #tpu.pipeline_mode<synchronous>, transform_indices = @transform_1, window_bounds = array<i64: 2, 128>}, {transform_indices = @transform_2, window_bounds = array<i64: 1, 2, 8, 128>}]} {
    %c0_i32 = arith.constant 0 : i32
    %0 = arith.cmpi eq, %arg2, %c0_i32 : i32
    %1 = arith.extui %0 : i1 to i32
    %c0_i32_0 = arith.constant 0 : i32
    %2 = arith.cmpi ne, %1, %c0_i32_0 : i32
    scf.if %2 {
      %c0_11 = arith.constant 0 : index
      %c0_12 = arith.constant 0 : index
      %c0_13 = arith.constant 0 : index
      %17 = vector.load %arg3[%c0_11, %c0_12, %c0_13] : memref<1x8x128xf32, #tpu.memory_space<vmem>>, vector<1x8x128xf32>
      %18 = vector.shape_cast %17 : vector<1x8x128xf32> to vector<8x128xf32>
      %19 = arith.mulf %18, %18 : vector<8x128xf32>
      %cst = arith.constant dense<0.000000e+00> : vector<8xf32>
      %20 = vector.multi_reduction <add>, %19, %cst [1] : vector<8x128xf32> to vector<8xf32>
      %21 = vector.shape_cast %20 : vector<8xf32> to vector<8x1xf32>
      %cst_14 = arith.constant 7.812500e-03 : f32
      %22 = vector.broadcast %cst_14 : f32 to vector<8x1xf32>
      %23 = arith.mulf %21, %22 : vector<8x1xf32>
      %cst_15 = arith.constant 9.99999974E-6 : f32
      %24 = vector.broadcast %cst_15 : f32 to vector<8x1xf32>
      %25 = arith.addf %23, %24 : vector<8x1xf32>
      %26 = math.rsqrt %25 : vector<8x1xf32>
      %27 = vector.broadcast %26 : vector<8x1xf32> to vector<8x128xf32>
      %28 = arith.mulf %18, %27 : vector<8x128xf32>
      %c0_16 = arith.constant 0 : index
      %c0_17 = arith.constant 0 : index
      %29 = vector.load %arg6[%c0_16, %c0_17] : memref<8x128xf32, #tpu.memory_space<vmem>>, vector<8x128xf32>
      tpu.vector_store %arg6[%c0_16, %c0_17], %28 {strides = array<i32>} : memref<8x128xf32, #tpu.memory_space<vmem>>, vector<8x128xf32>,
    } else {
    }
    %c0 = arith.constant 0 : index
    %c0_1 = arith.constant 0 : index
    %3 = vector.load %arg6[%c0, %c0_1] : memref<8x128xf32, #tpu.memory_space<vmem>>, vector<8x128xf32>
    %c0_2 = arith.constant 0 : index
    %c0_3 = arith.constant 0 : index
    %4 = vector.load %arg4[%c0_2, %c0_3] : memref<2x128xf32, #tpu.memory_space<vmem>>, vector<2x128xf32>
    %5 = vector.extract_strided_slice %4 {offsets = [0, 0], sizes = [1, 128], strides = [1, 1]} : vector<2x128xf32> to vector<1x128xf32>
    %6 = vector.broadcast %5 : vector<1x128xf32> to vector<8x128xf32>
    %7 = arith.mulf %3, %6 : vector<8x128xf32>
    %c0_4 = arith.constant 0 : index
    %c0_5 = arith.constant 0 : index
    %c0_6 = arith.constant 0 : index
    %c0_7 = arith.constant 0 : index
    %8 = vector.load %arg5[%c0_4, %c0_5, %c0_6, %c0_7] : memref<1x2x8x128xf32, #tpu.memory_space<vmem>>, vector<1x1x8x128xf32>
    %9 = vector.shape_cast %8 : vector<1x1x8x128xf32> to vector<8x128xf32>
    %10 = vector.shape_cast %7 : vector<8x128xf32> to vector<1x1x8x128xf32>
    tpu.vector_store %arg5[%c0_4, %c0_5, %c0_6, %c0_7], %10 {strides = array<i32>} : memref<1x2x8x128xf32, #tpu.memory_space<vmem>>, vector<1x1x8x128xf32>,
    %11 = vector.extract_strided_slice %4 {offsets = [1, 0], sizes = [1, 128], strides = [1, 1]} : vector<2x128xf32> to vector<1x128xf32>
    %12 = vector.broadcast %11 : vector<1x128xf32> to vector<8x128xf32>
    %13 = arith.mulf %3, %12 : vector<8x128xf32>
    %c0_8 = arith.constant 0 : index
    %c1 = arith.constant 1 : index
    %c0_9 = arith.constant 0 : index
    %c0_10 = arith.constant 0 : index
    %14 = vector.load %arg5[%c0_8, %c1, %c0_9, %c0_10] : memref<1x2x8x128xf32, #tpu.memory_space<vmem>>, vector<1x1x8x128xf32>
    %15 = vector.shape_cast %14 : vector<1x1x8x128xf32> to vector<8x128xf32>
    %16 = vector.shape_cast %13 : vector<8x128xf32> to vector<1x1x8x128xf32>
    tpu.vector_store %arg5[%c0_8, %c1, %c0_9, %c0_10], %16 {strides = array<i32>} : memref<1x2x8x128xf32, #tpu.memory_space<vmem>>, vector<1x1x8x128xf32>,
    return
  }
  func.func @transform_0(%arg0: i32, %arg1: i32, %arg2: i32) -> (i32, i32, i32) {
    %c0_i32 = arith.constant 0 : i32
    %c0_i32_0 = arith.constant 0 : i32
    return %arg0, %arg1, %c0_i32 : i32, i32, i32
  }
  func.func @transform_1(%arg0: i32, %arg1: i32, %arg2: i32) -> (i32, i32) {
    %c0_i32 = arith.constant 0 : i32
    %c0_i32_0 = arith.constant 0 : i32
    %c0_i32_1 = arith.constant 0 : i32
    return %c0_i32, %c0_i32_0 : i32, i32
  }
  func.func @transform_2(%arg0: i32, %arg1: i32, %arg2: i32) -> (i32, i32, i32, i32) {
    %c0_i32 = arith.constant 0 : i32
    %c0_i32_0 = arith.constant 0 : i32
    return %arg0, %arg2, %arg1, %c0_i32 : i32, i32, i32, i32
  }
}

</mosaic_0001>

<bundles_post_ra>
// kernel: tpu_custom_call.1
= control target key start
LH: loop header
LB: loop body
LE: loop exit
PB: predicated region body
PF: predicated region fallthrough
CT: control target
= control target key end

     0   :  { %7 = vsyncpa [#allocation4], 0  ;;  %s774_s0 = inlined_call_operand.hbm [shape: f32[2,8,128], index: 0, kind: input, shape index: {}]   ;;  %s775_s1 = inlined_call_operand.hbm [shape: f32[2,128], index: 1, kind: input, shape index: {}]   ;;  %s776_s2 = inlined_call_operand.hbm [shape: f32[2,2,8,128], index: 2, kind: output, shape index: {}]  }
   0x1   :  { %9 = vsyncpa [#allocation4 + $0x1], 0 }
   0x2   :  { %10 = vsyncpa [#allocation7], 0 }
   0x3   :  { %11 = vsyncpa [#allocation5], 0 }
   0x4   :  { %13 = vsyncpa [#allocation5 + $0x1], 0  ;;  %s598_s9 = smov 0   ;;  %s600_s10 = smov 0  }
   0x5   :  { %s602_s11 = smov 0   ;;  %s604_s12 = smov 0  }
   0x6   :  { %s606_s13 = smov 0   ;;  %s608_s14 = smov 0  }
   0x7 LB: > { %s343_s15 = sadd.s32 4294967295, %s576_s14   ;;  %s344_s16 = sadd.s32 4294967294, %s576_s14   ;;  %s576_s14 = sphi %s608_s14, %s19_s14   ;;  %s572_s13 = sphi %s606_s13, %s793_s13   ;;  %s568_s12 = sphi %s604_s12, %s792_s12   ;;  %s564_s11 = sphi %s602_s11, %s791_s11   ;;  %s560_s10 = sphi %s600_s10, %s790_s10   ;;  %s556_s9 = sphi %s598_s9, %s789_s9  }
   0x8   : > { %p60_p0 = scmp.ne.s32.totalorder %s560_s10, %s556_s9  ;;  %p632_p1 = scmp.eq.s32.totalorder %s343_s15, 0 }
   0x9   : > { %p636_p2 = scmp.eq.s32.totalorder %s343_s15, 1  ;;  %p115_p3 = scmp.eq.s32.totalorder %s344_s16, 1 }
   0xa   : > { %p642_p4 = por %p632_p1, %p60_p0  ;;  %p345_p5 = scmp.ge.s32.totalorder %s576_s14, 1 }
   0xb   : > { %p647_p6 = por %p115_p3, %p60_p0  ;;  %p122_p7 = scmp.lt.s32.totalorder %s576_s14, 3 }
   0xc   : > { %s780_s19 = scalar_select %p642_p4, 1, 0 }
   0xd   : > { %s781_s20 = scalar_select %p647_p6, 1, 0 }
   0xe   : > { %p652_p8 = pnand %p345_p5, %p122_p7  ;;  %s578_s22 = smov [#allocation6]  }
   0xf   : > { %s135_s23 = sshll.u32 %s578_s22, 4  ;;  %s38_s25 = sadd.s32 1, %s572_s13  ;;  %s136_s23 = int_to_ptr.vmem [resolvable:$true] %s135_s23 }
  0x10   : > { %p369_p10 = pneg %p652_p8  ;;  %s47_s26 = sadd.s32 1, %s564_s11 }
  0x11   : > { %p40_p12 = scmp.ge.s32.totalorder %s38_s25, 2  ;;  %s449_s27 = scalar_lea.vmem %s136_s23, 32 }
  0x12   : > { %p661_p11 = pnand %p369_p10, %p632_p1  ;;  %p450_p0 = scmp.ne.s32.totalorder %s136_s23, %s449_s27 }
  0x13   : > { %p457_p7 = scmp.lt.s32.totalorder %s136_s23, %s136_s23  ;;  %p458_p6 = scmp.lt.s32.totalorder %s449_s27, %s449_s27 }
  0x14   : > { %p440_p13 = pneg %p661_p11 }
  0x15   : > { %p459_p9 = por %p458_p6, %p457_p7 }
  0x16   : > { %p452_p3 = pnand %p450_p0, %p440_p13 }
  0x18   : > { %p453_p5 = pneg %p452_p3 }
  0x1a   : > { %p460_p4 = pnand %p459_p9, %p453_p5 }
  0x1c   : > { %463 = shalt.err (!%p460_p4)
}
  0x1d   : > { %372 = dma.hbm_to_vmem [thread:$0]  (!%p661_p11), %s775_s1, 32, %s136_s23, [#allocation7]  }
  0x1e   : > { %s795_s25 = smov (%p40_p12, %s38_s25), 0  ;;  %p54_p6 = scmp.ne.s32.totalorder %s564_s11, %s560_s10 }
  0x1f   : > { %p55_p4 = scmp.eq.s32.totalorder %s576_s14, 0  ;;  %s42_s30 = ssub.s32 %s572_s13, %s795_s25 }
  0x20   : > { %p382_p9 = scmp.lt.s32.totalorder %s576_s14, 2  ;;  %p45_p10 = scmp.eq.s32.totalorder %s42_s30, 0 }
  0x21   : > { %p56_p13 = por %p55_p4, %p54_p6  ;;  %p684_p0 = por %p636_p2, %p54_p6 }
  0x22   : > { %s146_s4 = sand.u32 1, %s564_s11   ;;  %s349_s7 = sshll.u32 %s572_s13, 7 }
  0x23   : > { %s690_s5 = scalar_select %p45_p10, %s564_s11, %s47_s26  }
  0x24   : > { %s348_s6 = sshll.u32 %s146_s4, 3  ;;  %s156_s16 = scalar_lea.hbm %s774_s0, %s349_s7 }
  0x25   : > { %s150_s22 = scalar_lea.vmem [#allocation3], %s348_s6  ;;  %p696_p11 = pnand %p382_p9, %p56_p13 }
  0x26   : > { %s158_s23 = sshll.u32 %s150_s22, 4  ;;  %s147_s18 = scalar_lea.sflag [#allocation4], %s146_s4  ;;  %s159_s23 = int_to_ptr.vmem [resolvable:$true] %s158_s23 }
  0x27   : > { %p466_p2 = pneg %p696_p11  ;;  %s477_s27 = scalar_lea.vmem %s159_s23, 128 }
  0x28   : > { %p478_p12 = scmp.ne.s32.totalorder %s159_s23, %s477_s27  ;;  %s579_s26 = smov [#allocation3]  }
  0x29   : > { %s482_s28 = sshll.u32 %s579_s26, 4  ;;  %s483_s28 = int_to_ptr.vmem [resolvable:$false] %s482_s28 }
  0x2a   : > { %p480_p3 = pnand %p478_p12, %p466_p2  ;;  %s484_s29 = scalar_lea.vmem %s483_s28, 256 }
  0x2b   : > { %p485_p7 = scmp.lt.s32.totalorder %s159_s23, %s483_s28  ;;  %p486_p6 = scmp.lt.s32.totalorder %s484_s29, %s477_s27 }
  0x2c   : > { %p481_p5 = pneg %p480_p3 }
  0x2d   : > { %p487_p4 = por %p486_p6, %p485_p7 }
  0x2f   : > { %p488_p10 = pnand %p487_p4, %p481_p5 }
  0x31   : > { %491 = shalt.err (!%p488_p10)
}
  0x32   : > { %376 = dma.hbm_to_vmem [thread:$0]  (!%p696_p11), %s156_s16, 128, %s159_s23, %s147_s18  }
  0x33   : > { %167 = sbr.rel (%p652_p8) target bundleno = 236 (0xec), region = 28  ;;  %s707_s30 = sand.u32 (!%p652_p8), 1, %s560_s10  }
  0x34   : > { %s351_s4 = sshll.u32 (!%p652_p8), %s707_s30, 3  ;;  %s170_s6 = scalar_lea.sflag (!%p652_p8), [#allocation4], %s707_s30 }
  0x35   : > { %s173_s7 = scalar_lea.vmem (!%p652_p8), [#allocation3], %s351_s4  ;;  %p786_p9 = scmp.ne.s32.totalorder (!%p652_p8), %s780_s19, 0 }
  0x38   : > { %543 = dma.done.wait (%p786_p9), %s170_s6, 128  }
  0x39   : > { %545 = vsyncadd (%p786_p9), %s170_s6, 4294967168 }
  0x3a   : > { %547 = dma.done.wait (%p632_p1), [#allocation7], 32  }
  0x3b   : > { %549 = vsyncadd (%p632_p1), [#allocation7], 4294967264  ;;  %v203_v0 = vld [vmem:[%s173_s7] sm:$0xff]  ;;  %v214_v5 = vlaneseq  ;;  %s353_s21 = sshll.u32 %s707_s30, 4  ;;  %v213_v9 = vld [vmem:[#allocation6] sm:$0x3] }
  0x3c   : > { %v204_v1 = vmul.f32 %v203_v0, %v203_v0  ;;  %s360_s17 = sshll.u32 %s568_s12, 8  ;;  %s197_s19 = scalar_lea.vmem [#allocation8], %s353_s21 }
  0x3d   : > { %v215_v6 = vshrl.u32 %v214_v5, 7  ;;  %s244_s8 = sshll.u32 %s197_s19, 4  ;;  %s724_s22 = scalar_lea.hbm %s776_s2, %s360_s17  ;;  %s726_s8 = int_to_ptr.vmem [resolvable:$true] %s244_s8 }
  0x3e   : > { %205 = vadd.xlane.f32.xlu0 %v204_v1  ;;  %s228_s23 = scalar_lea.sflag [#allocation5], %s707_s30  ;;  %s492_s12 = scalar_lea.vmem %s726_s8, 256 }
  0x3f   : > { %v216_v7 = vsub.s32 0, %v215_v6  ;;  %v222_v8 = vsub.s32 1, %v215_v6  ;;  %p493_p1 = scmp.ne.s32.totalorder %s726_s8, %s492_s12  ;;  %s580_s24 = smov [#allocation8]  }
  0x40   : > { %s496_s18 = sshll.u32 %s580_s24, 4  ;;  %s497_s18 = int_to_ptr.vmem [resolvable:$false] %s496_s18 }
  0x41   : > { %v217_v10 = vrot.slane %v213_v9, %v216_v7  ;;  %v223_v11 = vrot.slane %v213_v9, %v222_v8  ;;  %p494_p8 = pnand %p493_p1, %p684_p0  ;;  %s498_s27 = scalar_lea.vmem %s497_s18, 512 }
  0x42   : > { %p499_p11 = scmp.lt.s32.totalorder %s726_s8, %s497_s18  ;;  %p500_p2 = scmp.lt.s32.totalorder %s498_s27, %s492_s12 }
  0x43   : > { %p495_p13 = pneg %p494_p8 }
  0x44   : > { %p501_p12 = por %p500_p2, %p499_p11 }
  0x46   : > { %p502_p3 = pnand %p501_p12, %p495_p13 }
  0xc7   : > { %v206_v2 = vpop.xlane.xlu0 %205 }
  0xc8   : > { %v207_v3 = vmul.f32 0.0078125, %v206_v2 }
  0xca   : > { %v208_v4 = vadd.f32 1e-05, %v207_v3 }
  0xcc   : > { %436 = vrsqrt.f32 %v208_v4 }
  0xd9   : > { %v437_v12 = vpop.eup %436 }
  0xda   : > { %v210_v13 = vmul.f32 %v437_v12, %v203_v0 }
  0xdc   : > { %v218_v14 = vmul.f32 %v217_v10, %v210_v13  ;;  %v224_v15 = vmul.f32 %v223_v11, %v210_v13 }
  0xde   : > { %219 = vst [vmem:[%s197_s19] sm:$0xff] %v218_v14  ;;  %354 = vst [vmem:[%s197_s19 + $0x8] sm:$0xff] %v224_v15 }
  0xdf   : > { %505 = shalt.err (!%p502_p3)
}
  0xe0   : > { %s506_s26 = scalar_lea.hbm %s724_s22, 256  ;;  %s510_s4 = scalar_lea.hbm %s776_s2, 512 }
  0xe1   : > { %p507_p5 = scmp.ne.s32.totalorder %s724_s22, %s506_s26  ;;  %p511_p4 = scmp.lt.s32.totalorder %s724_s22, %s776_s2 }
  0xe2   : > { %p512_p10 = scmp.lt.s32.totalorder %s510_s4, %s506_s26 }
  0xe3   : > { %p508_p7 = pnand %p507_p5, %p684_p0 }
  0xe4   : > { %p513_p9 = por %p512_p10, %p511_p4 }
  0xe5   : > { %p509_p6 = pneg %p508_p7 }
  0xe7   : > { %p514_p1 = pnand %p513_p9, %p509_p6 }
  0xe9   : > { %517 = shalt.err (!%p514_p1)
}
  0xea   : > { %s581_s21 = smov 128   ;;  %s582_s17 = smov 8  }
  0xeb   : > { %367 = dma.vmem_to_hbm [thread:$0]  (%p684_p0), %s726_s8, 256, %s724_s22, %s228_s23, %s581_s21, %s581_s21, %s582_s17  }
  0xec PF: > { %s259_s19 = sand.u32 1, %s556_s9   ;;  %p787_p8 = scmp.ne.s32.totalorder %s781_s20, 0 }
  0xed   : > { %p788_p13 = scmp.ge.s32.totalorder %s576_s14, 2  ;;  %s260_s15 = scalar_lea.sflag [#allocation5], %s259_s19 }
  0xef   : > { %p378_p11 = pnand %p788_p13, %p787_p8 }
  0xf1   : > { %p379_p2 = pneg %p378_p11 }
  0xf3   : > { %551 = dma.done.wait (%p379_p2), %s260_s15, 256  }
  0xf4   : > { %553 = vsyncadd (%p379_p2), %s260_s15, 4294967040  ;;  %s19_s14 = sadd.s32 1, %s576_s14   ;;  %s789_s9 = smov %s560_s10 }
  0xf5   : > { %p16_p12 = scmp.ge.s32.totalorder %s19_s14, 4   ;;  %s790_s10 = smov %s564_s11 }
  0xf6   : > { %s791_s11 = smov %s690_s5  ;;  %s792_s12 = smov %s572_s13 }
  0xf7   : > { %s793_s13 = smov %s795_s25  ;;  %18 = sbr.rel (!%p16_p12) target bundleno = 7 (0x7), region = 82 }
  0xfc   :  { %265 = vsyncpa [#allocation4], 1 }
  0xfd   :  { %267 = vsyncpa [#allocation4 + $0x1], 1 }
  0xfe   :  { %268 = vsyncpa [#allocation7], 1 }
  0xff   :  { %269 = vsyncpa [#allocation5], 1 }
 0x100   :  { %271 = vsyncpa [#allocation5 + $0x1], 1 }

</bundles_post_ra>
